<compile_context>
chip_gen: v5e
topology: v5e:2x2
jax: 0.10.0
libtpu: 0.0.40
codegen_flags: <defaults>
</compile_context>

<pallas_src>
import functools

import jax
import jax.numpy as jnp
from jax.experimental import pallas as pl
from jax.experimental.pallas import tpu as pltpu

_LANE = 128


def _round_up(v, m):
    return (v + m - 1) // m * m


def _mlp_kernel(x_ref, *refs, n_layers, apply_sigmoid, out_widths):
    """refs = (w0, w1, ..., w_{L-1}, b_concat, out_ref)."""
    out_ref = refs[-1]
    b_ref = refs[-2]
    w_refs = refs[:-2]

    h = x_ref[...]                              # bf16 activations feed the MXU
    off = 0
    for i in range(n_layers):
        w = w_refs[i][...]                      # bf16 weights, VMEM-resident
        width = out_widths[i]
        b = b_ref[:, off:off + width]           # static slice of f32 bias row
        off += width
        z = jnp.dot(h, w, preferred_element_type=jnp.float32) + b   # f32 acc
        if i < n_layers - 1:
            z = jnp.maximum(z, 0.0)             # ReLU in f32 (v5e-safe)
            h = z.astype(jnp.bfloat16)          # back to bf16 for next matmul
        else:
            h = z
    if apply_sigmoid:                           # eval-mode branch (EUP slot)
        h = jax.nn.sigmoid(h)
    out_ref[...] = h.astype(out_ref.dtype)


def init_onts_mlp_params(key, J, T, n_features, n_hidden, hidden_size):
    """Deterministic PyTorch-style init: U(-1/sqrt(fan_in), 1/sqrt(fan_in)).

    Weights are stored transposed as (in, out) so y = x @ W + b matches
    PyTorch's y = x @ W_pt.T + b with W_pt of shape (out, in).
    """
    n_in = J * n_features
    n_out = J * T * 2
    dims = [n_in] + [hidden_size] * n_hidden + [n_out]
    params = []
    for i in range(len(dims) - 1):
        fan_in, fan_out = dims[i], dims[i + 1]
        key, kw, kb = jax.random.split(key, 3)
        bound = 1.0 / jnp.sqrt(jnp.float32(fan_in))
        w = jax.random.uniform(kw, (fan_in, fan_out), jnp.float32, -bound, bound)
        b = jax.random.uniform(kb, (fan_out,), jnp.float32, -bound, bound)
        params.append((w, b))
    return params


def _pad_params(params):
    """Zero-pad every layer's output width up to a multiple of 128 lanes.

    Returns (bf16 weight list, f32 concatenated bias row, padded widths).
    Padded columns carry zero weight and zero bias, so the extra lanes are
    exactly zero through every hidden layer (ReLU(0)=0) and are sliced off
    the final output in the wrapper.
    """
    ws, bs, widths = [], [], []
    in_pad = params[0][0].shape[0]
    for w, b in params:
        fan_in, fan_out = w.shape
        out_pad = _round_up(fan_out, _LANE)
        w_p = jnp.zeros((in_pad, out_pad), jnp.float32).at[:fan_in, :fan_out].set(w)
        b_p = jnp.zeros((out_pad,), jnp.float32).at[:fan_out].set(b)
        ws.append(w_p.astype(jnp.bfloat16))
        bs.append(b_p)
        widths.append(out_pad)
        in_pad = out_pad
    return ws, jnp.concatenate(bs).reshape(1, -1), tuple(widths)


def onts_mlp_forward(x, params, *, training=False, tile_b=1024):
    """x: (B, J, n_features) -> (B, J*T*2). Sigmoid applied iff not training."""
    B = x.shape[0]
    n_in = params[0][0].shape[0]
    n_out = params[-1][0].shape[1]

    x2 = x.reshape(B, -1).astype(jnp.bfloat16)          # bf16 halves x DMA bytes

    ws, b_concat, out_widths = _pad_params(params)
    n_out_pad = out_widths[-1]
    n_layers = len(ws)

    # Batch tiling: multiple-of-8 tile, batch padded to a whole number of tiles.
    tb = min(tile_b, _round_up(B, 8))
    b_pad = _round_up(B, tb)
    if b_pad != B:
        x2 = jnp.pad(x2, ((0, b_pad - B), (0, 0)))
    grid = (b_pad // tb,)

    kernel = functools.partial(
        _mlp_kernel,
        n_layers=n_layers,
        apply_sigmoid=not training,
        out_widths=out_widths,
    )

    in_specs = [pl.BlockSpec((tb, n_in), lambda i: (i, 0))]          # tiled x
    for w in ws:                                                     # resident W
        in_specs.append(pl.BlockSpec(w.shape, lambda i: (0, 0)))
    in_specs.append(pl.BlockSpec(b_concat.shape, lambda i: (0, 0)))  # resident b

    # Advisory cost estimate for XLA's scheduler.
    flops, d = 0, n_in
    for wd in out_widths:
        flops += 2 * b_pad * d * wd
        d = wd
    bytes_accessed = (
        int(x2.size) * 2
        + sum(int(w.size) * 2 for w in ws)
        + int(b_concat.size) * 4
        + b_pad * n_out_pad * 4
    )
    transcendentals = 0 if training else b_pad * n_out_pad

    out_padded = pl.pallas_call(
        kernel,
        out_shape=jax.ShapeDtypeStruct((b_pad, n_out_pad), jnp.float32),
        grid=grid,
        in_specs=in_specs,
        out_specs=pl.BlockSpec((tb, n_out_pad), lambda i: (i, 0)),
        compiler_params=pltpu.CompilerParams(
            dimension_semantics=("parallel",),
        ),
        cost_estimate=pl.CostEstimate(
            flops=flops,
            transcendentals=transcendentals,
            bytes_accessed=bytes_accessed,
        ),
    )(x2, *ws, b_concat)

    return out_padded[:B, :n_out]


def _reference_forward(x, params, *, training=False):
    """Pure-JAX reference mirroring the kernel's bf16-matmul / f32-accumulate."""
    h = x.reshape(x.shape[0], -1).astype(jnp.float32)
    for i, (w, b) in enumerate(params):
        h = jnp.dot(h.astype(jnp.bfloat16), w.astype(jnp.bfloat16),
                    preferred_element_type=jnp.float32) + b
        if i < len(params) - 1:
            h = jnp.maximum(h, 0.0)
    return h if training else jax.nn.sigmoid(h)


if __name__ == "__main__":
    # Small shapes consistent with ONTSMLP(J, T, n_features, n_hidden, hidden_size)
    J, T, n_features, n_hidden, hidden_size = 4, 8, 4, 2, 32
    B = 8

    key = jax.random.PRNGKey(0)
    key, kx = jax.random.split(key)
    x = jax.random.normal(kx, (B, J, n_features), dtype=jnp.float32)
    params = init_onts_mlp_params(key, J, T, n_features, n_hidden, hidden_size)

    # Eval-mode forward (sigmoid branch).
    out = jax.block_until_ready(onts_mlp_forward(x, params, training=False))
    ref = _reference_forward(x, params, training=False)
    assert out.shape == (B, J * T * 2)
    assert jnp.allclose(out, ref, atol=1e-2, rtol=1e-2)

    # Training-mode forward (raw logits branch).
    out_tr = jax.block_until_ready(onts_mlp_forward(x, params, training=True))
    ref_tr = _reference_forward(x, params, training=True)
    assert jnp.allclose(out_tr, ref_tr, atol=5e-2, rtol=5e-2)

    # Exercise a multi-step grid (batch padding + pipelining path).
    B2 = 300
    key, kx2 = jax.random.split(key)
    x2 = jax.random.normal(kx2, (B2, J, n_features), dtype=jnp.float32)
    out2 = jax.block_until_ready(
        onts_mlp_forward(x2, params, training=False, tile_b=128))
    ref2 = _reference_forward(x2, params, training=False)
    assert out2.shape == (B2, J * T * 2)
    assert jnp.allclose(out2, ref2, atol=1e-2, rtol=1e-2)

    print("KERNEL_OK")
</pallas_src>

<mosaic_0001>
module attributes {stable_mosaic.version = 11 : i64} {
  func.func @_mlp_kernel(%arg0: i32, %arg1: memref<8x16xbf16, #tpu.memory_space<vmem>>, %arg2: memref<16x128xbf16, #tpu.memory_space<vmem>>, %arg3: memref<128x128xbf16, #tpu.memory_space<vmem>>, %arg4: memref<128x128xbf16, #tpu.memory_space<vmem>>, %arg5: memref<1x384xf32, #tpu.memory_space<vmem>>, %arg6: memref<8x128xf32, #tpu.memory_space<vmem>>) attributes {dimension_semantics = [#tpu.dimension_semantics<parallel>], iteration_bounds = array<i64: 1>, scalar_prefetch = 0 : i64, scratch_operands = 0 : i64, tpu.core_type = #tpu.core_type<tc>, window_params = [{transform_indices = @transform_0, window_bounds = array<i64: 8, 16>}, {pipeline_mode = #tpu.pipeline_mode<synchronous>, transform_indices = @transform_1, window_bounds = array<i64: 16, 128>}, {pipeline_mode = #tpu.pipeline_mode<synchronous>, transform_indices = @transform_2, window_bounds = array<i64: 128, 128>}, {pipeline_mode = #tpu.pipeline_mode<synchronous>, transform_indices = @transform_3, window_bounds = array<i64: 128, 128>}, {pipeline_mode = #tpu.pipeline_mode<synchronous>, transform_indices = @transform_4, window_bounds = array<i64: 1, 384>}, {transform_indices = @transform_5, window_bounds = array<i64: 8, 128>}]} {
    %c0 = arith.constant 0 : index
    %c0_0 = arith.constant 0 : index
    %0 = vector.load %arg1[%c0, %c0_0] : memref<8x16xbf16, #tpu.memory_space<vmem>>, vector<8x16xbf16>
    %c0_1 = arith.constant 0 : index
    %c0_2 = arith.constant 0 : index
    %1 = vector.load %arg2[%c0_1, %c0_2] : memref<16x128xbf16, #tpu.memory_space<vmem>>, vector<16x128xbf16>
    %c0_3 = arith.constant 0 : index
    %c0_4 = arith.constant 0 : index
    %2 = vector.load %arg5[%c0_3, %c0_4] : memref<1x384xf32, #tpu.memory_space<vmem>>, vector<1x128xf32>
    %cst = arith.constant dense<0.000000e+00> : vector<8x128xf32>
    %3 = tpu.matmul %0, %1, %cst {dimension_numbers = #tpu.dot_dimension_numbers<[1], [0], [0], [1], [0, 0, 1, 1], [], []>} : vector<8x16xbf16>, vector<16x128xbf16>, vector<8x128xf32> -> vector<8x128xf32>
    %4 = vector.broadcast %2 : vector<1x128xf32> to vector<8x128xf32>
    %5 = arith.addf %3, %4 : vector<8x128xf32>
    %cst_5 = arith.constant 0.000000e+00 : f32
    %6 = vector.broadcast %cst_5 : f32 to vector<8x128xf32>
    %7 = arith.maximumf %5, %6 : vector<8x128xf32>
    %8 = arith.truncf %7 : vector<8x128xf32> to vector<8x128xbf16>
    %c0_6 = arith.constant 0 : index
    %c0_7 = arith.constant 0 : index
    %9 = vector.load %arg3[%c0_6, %c0_7] : memref<128x128xbf16, #tpu.memory_space<vmem>>, vector<128x128xbf16>
    %c0_8 = arith.constant 0 : index
    %c128 = arith.constant 128 : index
    %10 = vector.load %arg5[%c0_8, %c128] : memref<1x384xf32, #tpu.memory_space<vmem>>, vector<1x128xf32>
    %cst_9 = arith.constant dense<0.000000e+00> : vector<8x128xf32>
    %11 = tpu.matmul %8, %9, %cst_9 {dimension_numbers = #tpu.dot_dimension_numbers<[1], [0], [0], [1], [0, 0, 1, 1], [], []>} : vector<8x128xbf16>, vector<128x128xbf16>, vector<8x128xf32> -> vector<8x128xf32>
    %12 = vector.broadcast %10 : vector<1x128xf32> to vector<8x128xf32>
    %13 = arith.addf %11, %12 : vector<8x128xf32>
    %cst_10 = arith.constant 0.000000e+00 : f32
    %14 = vector.broadcast %cst_10 : f32 to vector<8x128xf32>
    %15 = arith.maximumf %13, %14 : vector<8x128xf32>
    %16 = arith.truncf %15 : vector<8x128xf32> to vector<8x128xbf16>
    %c0_11 = arith.constant 0 : index
    %c0_12 = arith.constant 0 : index
    %17 = vector.load %arg4[%c0_11, %c0_12] : memref<128x128xbf16, #tpu.memory_space<vmem>>, vector<128x128xbf16>
    %c0_13 = arith.constant 0 : index
    %c256 = arith.constant 256 : index
    %18 = vector.load %arg5[%c0_13, %c256] : memref<1x384xf32, #tpu.memory_space<vmem>>, vector<1x128xf32>
    %cst_14 = arith.constant dense<0.000000e+00> : vector<8x128xf32>
    %19 = tpu.matmul %16, %17, %cst_14 {dimension_numbers = #tpu.dot_dimension_numbers<[1], [0], [0], [1], [0, 0, 1, 1], [], []>} : vector<8x128xbf16>, vector<128x128xbf16>, vector<8x128xf32> -> vector<8x128xf32>
    %20 = vector.broadcast %18 : vector<1x128xf32> to vector<8x128xf32>
    %21 = arith.addf %19, %20 : vector<8x128xf32>
    %22 = arith.negf %21 : vector<8x128xf32>
    %23 = math.exp %22 : vector<8x128xf32>
    %cst_15 = arith.constant 1.000000e+00 : f32
    %24 = vector.broadcast %cst_15 : f32 to vector<8x128xf32>
    %25 = arith.addf %24, %23 : vector<8x128xf32>
    %26 = arith.divf %24, %25 : vector<8x128xf32>
    %c0_16 = arith.constant 0 : index
    %c0_17 = arith.constant 0 : index
    %27 = vector.load %arg6[%c0_16, %c0_17] : memref<8x128xf32, #tpu.memory_space<vmem>>, vector<8x128xf32>
    tpu.vector_store %arg6[%c0_16, %c0_17], %26 {strides = array<i32>} : memref<8x128xf32, #tpu.memory_space<vmem>>, vector<8x128xf32>,
    return
  }
  func.func @transform_0(%arg0: i32) -> (i32, i32) {
    %c0_i32 = arith.constant 0 : i32
    %c0_i32_0 = arith.constant 0 : i32
    return %arg0, %c0_i32 : i32, i32
  }
  func.func @transform_1(%arg0: i32) -> (i32, i32) {
    %c0_i32 = arith.constant 0 : i32
    %c0_i32_0 = arith.constant 0 : i32
    %c0_i32_1 = arith.constant 0 : i32
    return %c0_i32, %c0_i32_0 : i32, i32
  }
  func.func @transform_2(%arg0: i32) -> (i32, i32) {
    %c0_i32 = arith.constant 0 : i32
    %c0_i32_0 = arith.constant 0 : i32
    %c0_i32_1 = arith.constant 0 : i32
    return %c0_i32, %c0_i32_0 : i32, i32
  }
  func.func @transform_3(%arg0: i32) -> (i32, i32) {
    %c0_i32 = arith.constant 0 : i32
    %c0_i32_0 = arith.constant 0 : i32
    %c0_i32_1 = arith.constant 0 : i32
    return %c0_i32, %c0_i32_0 : i32, i32
  }
  func.func @transform_4(%arg0: i32) -> (i32, i32) {
    %c0_i32 = arith.constant 0 : i32
    %c0_i32_0 = arith.constant 0 : i32
    %c0_i32_1 = arith.constant 0 : i32
    return %c0_i32, %c0_i32_0 : i32, i32
  }
  func.func @transform_5(%arg0: i32) -> (i32, i32) {
    %c0_i32 = arith.constant 0 : i32
    %c0_i32_0 = arith.constant 0 : i32
    return %arg0, %c0_i32 : i32, i32
  }
}

</mosaic_0001>

<bundles_post_ra>
// kernel: tpu_custom_call.1
= control target key start
LH: loop header
LB: loop body
LE: loop exit
PB: predicated region body
PF: predicated region fallthrough
CT: control target
= control target key end

     0   :  { %10 = vsyncpa [#allocation3], 0  ;;  %s608_s0 = inlined_call_operand.hbm [shape: bf16[8,16], index: 0, kind: input, shape index: {}]   ;;  %s609_s1 = inlined_call_operand.hbm [shape: bf16[16,128], index: 1, kind: input, shape index: {}]   ;;  %s610_s2 = inlined_call_operand.hbm [shape: bf16[128,128], index: 2, kind: input, shape index: {}]   ;;  %s611_s3 = inlined_call_operand.hbm [shape: bf16[128,128], index: 3, kind: input, shape index: {}]   ;;  %s612_s4 = inlined_call_operand.vmem [shape: f32[1,384], index: 4, kind: input, shape index: {}]   ;;  %s613_s5 = inlined_call_operand.hbm [shape: f32[8,128], index: 5, kind: output, shape index: {}]  }
   0x1   :  { %11 = vsyncpa [#allocation6], 0 }
   0x2   :  { %12 = vsyncpa [#allocation9], 0  ;;  %s29_s20 = sshll.u32 %s609_s1, 4  ;;  %s30_s20 = int_to_ptr.hbm [resolvable:$true] %s29_s20 }
   0x3   :  { %13 = vsyncpa [#allocation4], 0  ;;  %s547_s21 = smov [#allocation5]   ;;  %s19_s25 = sshll.u32 %s608_s0, 4  ;;  %s20_s25 = int_to_ptr.hbm [resolvable:$true] %s19_s25 }
   0x4   :  { %s31_s22 = sshll.u32 %s547_s21, 4  ;;  %s548_s26 = smov 64   ;;  %s32_s22 = int_to_ptr.vmem [resolvable:$true] %s31_s22 }
   0x5   :  { %s549_s27 = smov 4   ;;  %s550_s28 = smov [#allocation2]  }
   0x6   :  { %37 = dma.hbm_to_vmem [thread:$0]  %s30_s20, 128, %s32_s22, [#allocation6], %s548_s26, %s548_s26, %s549_s27  }
   0x7   :  { %s21_s29 = sshll.u32 %s550_s28, 4  ;;  %s42_s7 = sshll.u32 %s610_s2, 4  ;;  %s22_s29 = int_to_ptr.vmem [resolvable:$true] %s21_s29  ;;  %s43_s7 = int_to_ptr.hbm [resolvable:$true] %s42_s7 }
   0x8   :  { %24 = dma.hbm_to_vmem [thread:$0]  %s20_s25, 64, %s22_s29, [#allocation3]  }
   0x9   :  { %s55_s9 = sshll.u32 %s611_s3, 4  ;;  %s551_s10 = smov [#allocation7]   ;;  %s56_s9 = int_to_ptr.hbm [resolvable:$true] %s55_s9 }
   0xa   :  { %s44_s11 = sshll.u32 %s551_s10, 4  ;;  %s552_s0 = smov [#allocation8]   ;;  %s45_s11 = int_to_ptr.vmem [resolvable:$true] %s44_s11 }
   0xb   :  { %50 = dma.hbm_to_vmem [thread:$0]  %s43_s7, 1024, %s45_s11, [#allocation6], %s548_s26, %s548_s26, %s549_s27  }
   0xc   :  { %s57_s12 = sshll.u32 %s552_s0, 4  ;;  %s58_s12 = int_to_ptr.vmem [resolvable:$true] %s57_s12 }
   0xd   :  { %63 = dma.hbm_to_vmem [thread:$0]  %s56_s9, 1024, %s58_s12, [#allocation9], %s548_s26, %s548_s26, %s549_s27  }
   0xe   :  { %539 = dma.done.wait [#allocation3], 64  }
   0xf   :  { %540 = vsyncadd [#allocation3], 4294967232 }
  0x10   :  { %541 = dma.done.wait [#allocation6], 1152  }
  0x11   :  { %542 = vsyncadd [#allocation6], 4294966144 }
  0x12   :  { %543 = dma.done.wait [#allocation9], 1024  }
  0x13   :  { %544 = vsyncadd [#allocation9], 4294966272  ;;  %v388_v0 = vld [vmem:[#allocation5] sm:$0xff]  ;;  %v83_v2 = vld [vmem:[#allocation2] sm:$0xf]  ;;  %vm96_vm0 = vcmask 130048  }
  0x14   :  { %v396_v1 = vld [vmem:[#allocation7 + $0x38] sm:$0xff]  ;;  %107 = vmatpush.bf16.msra.mxu0 %v388_v0  ;;  %v395_v3 = vld [vmem:[#allocation7 + $0x30] sm:$0xff]  ;;  %v394_v4 = vld [vmem:[#allocation7 + $0x28] sm:$0xff]  ;;  %s553_s17 = smov [#allocation10]  }
  0x15   :  { %183 = vmatpush.bf16.msra.mxu1 %v396_v1  ;;  %v393_v5 = vld [vmem:[#allocation7 + $0x20] sm:$0xff]  ;;  %v392_v6 = vld [vmem:[#allocation7 + $0x18] sm:$0xff]  ;;  %v391_v7 = vld [vmem:[#allocation7 + $0x10] sm:$0xff]  ;;  %s304_s18 = sshll.u32 %s553_s17, 4  ;;  %s305_s18 = int_to_ptr.vmem [resolvable:$true] %s304_s18 }
  0x16   :  { %v390_v8 = vld [vmem:[#allocation7 + $0x8] sm:$0xff]  ;;  %v389_v9 = vld [vmem:[#allocation7] sm:$0xff]  ;;  %v404_v10 = vld [vmem:[#allocation8 + $0x38] sm:$0xff] }
  0x17   :  { %322 = vmatmul.msk.bf16.vlgmr.msra.gmra.mxu0 %vm96_vm0, %v83_v2  ;;  %266 = vmatpush.bf16.msra.mxu2 %v404_v10  ;;  %v403_v11 = vld [vmem:[#allocation8 + $0x30] sm:$0xff]  ;;  %v402_v12 = vld [vmem:[#allocation8 + $0x28] sm:$0xff]  ;;  %v401_v13 = vld [vmem:[#allocation8 + $0x20] sm:$0xff] }
  0x18   :  { %v400_v14 = vld [vmem:[#allocation8 + $0x18] sm:$0xff]  ;;  %v399_v15 = vld [vmem:[#allocation8 + $0x10] sm:$0xff]  ;;  %v398_v22 = vld [vmem:[#allocation8 + $0x8] sm:$0xff] }
  0x19   :  { %184 = vmatpush.bf16.msra.mxu1 %v395_v3  ;;  %v412_v16 = vld [vmem:[%s612_s4] ss:$0 sm:$0xff]  ;;  %v397_v23 = vld [vmem:[#allocation8] sm:$0xff]  ;;  %v413_v24 = vld [vmem:[%s612_s4 + $0x1] ss:$0 sm:$0xff] }
  0x1a   :  { %v414_v30 = vld [vmem:[%s612_s4 + $0x2] ss:$0 sm:$0xff]  ;;  %s306_s4 = sshll.u32 %s613_s5, 4  ;;  %s307_s4 = int_to_ptr.hbm [resolvable:$true] %s306_s4 }
  0x1b   :  { %267 = vmatpush.bf16.msra.mxu2 %v403_v11 }
  0x1d   :  { %185 = vmatpush.bf16.msra.mxu1 %v394_v4 }
  0x1f   :  { %268 = vmatpush.bf16.msra.mxu2 %v402_v12 }
  0x21   :  { %186 = vmatpush.bf16.msra.mxu1 %v393_v5 }
  0x23   :  { %269 = vmatpush.bf16.msra.mxu2 %v401_v13 }
  0x25   :  { %187 = vmatpush.bf16.msra.mxu1 %v392_v6 }
  0x27   :  { %270 = vmatpush.bf16.msra.mxu2 %v400_v14 }
  0x29   :  { %188 = vmatpush.bf16.msra.mxu1 %v391_v7 }
  0x2b   :  { %271 = vmatpush.bf16.msra.mxu2 %v399_v15 }
  0x2d   :  { %189 = vmatpush.bf16.msra.mxu1 %v390_v8 }
  0x2f   :  { %272 = vmatpush.bf16.msra.mxu2 %v398_v22 }
  0x31   :  { %190 = vmatpush.bf16.msra.mxu1 %v389_v9 }
  0x33   :  { %273 = vmatpush.bf16.msra.mxu2 %v397_v23 }
  0x94   :  { %v109_v17 = vpop.f32.mrf.mxu0 }
  0x95   :  { %v110_v18 = vadd.f32 %v412_v16, %v109_v17 }
  0x97   :  { %v113_v19 = vmax.f32 %v110_v18, 0.0 }
  0x99   :  { %v114_v20 = vpack.c.bf16 %v113_v19, %v113_v19 }
  0x9b   :  { %191 = vmatmul.bf16.vlgmr.msra.gmra.mxu1 %v114_v20 }
  0x9c   :  { %v111_v21 = vpop.f32.mrf.mxu0 }
 0x118   :  { %v192_v25 = vpop.f32.mrf.mxu1 }
 0x119   :  { %v193_v26 = vadd.f32 %v413_v24, %v192_v25 }
 0x11b   :  { %v196_v27 = vmax.f32 %v193_v26, 0.0 }
 0x11d   :  { %v197_v28 = vpack.c.bf16 %v196_v27, %v196_v27 }
 0x11f   :  { %274 = vmatmul.bf16.vlgmr.msra.gmra.mxu2 %v197_v28 }
 0x120   :  { %v194_v29 = vpop.f32.mrf.mxu1 }
 0x1a2   :  { %v275_v31 = vpop.f32.mrf.mxu2 }
 0x1a3   :  { %v276_v32 = vadd.f32 %v414_v30, %v275_v31 }
 0x1a5   :  { %v387_v33 = vmul.f32 -1.442695, %v276_v32 }
 0x1a7   :  { %415 = vpow2.f32 %v387_v33 }
 0x1aa   :  { %v277_v34 = vpop.f32.mrf.mxu2 }
 0x1ad   :  { %v416_v35 = vpop.eup %415 }
 0x1ae   :  { %v282_v36 = vadd.f32 1.0, %v416_v35 }
 0x1b0   :  { %417 = vrcp.f32 %v282_v36  ;;  %v294_v40 = vand.u32 2147483648, %v282_v36  ;;  %v292_v42 = vand.u32 2147483647, %v282_v36  ;;  %vm288_vm2 = vweird.f32 %v282_v36 }
 0x1b2   :  { %v295_v44 = vor.u32 1.1754944e-38, %v294_v40  ;;  %vm293_vm4 = vcmp.eq.f32.partialorder %v292_v42, 8.507059e+37 }
 0x1b6   :  { %v418_v37 = vpop.eup %417 }
 0x1b7   :  { %v284_v38 = vmul.f32 %v418_v37, %v282_v36  ;;  %vm289_vm1 = vweird.f32 %v418_v37 }
 0x1b8   :  { %vm290_vm3 = vmor %vm288_vm2, %vm289_vm1 }
 0x1b9   :  { %v285_v39 = vsub.f32 1.0, %v284_v38 }
 0x1bb   :  { %v286_v41 = vmul.f32 %v418_v37, %v285_v39 }
 0x1bd   :  { %v287_v43 = vadd.f32 %v418_v37, %v286_v41 }
 0x1bf   :  { %v291_v45 = vsel %vm290_vm3, %v418_v37, %v287_v43 }
 0x1c0   :  { %v296_v46 = vsel %vm293_vm4, %v295_v44, %v291_v45 }
 0x1c1   :  { %298 = vst [vmem:[#allocation10] sm:$0xff] %v296_v46 }
 0x1c2   :  { %309 = dma.vmem_to_hbm [thread:$0]  %s305_s18, 128, %s307_s4, [#allocation4]  }
 0x1c3   :  { %545 = dma.done.wait [#allocation4], 128  }
 0x1c4   :  { %546 = vsyncadd [#allocation4], 4294967168 }
 0x1c5   :  { %314 = vsyncpa [#allocation3], 1 }
 0x1c6   :  { %315 = vsyncpa [#allocation6], 1 }
 0x1c7   :  { %316 = vsyncpa [#allocation9], 1 }
 0x1c8   :  { %317 = vsyncpa [#allocation4], 1 }

</bundles_post_ra>
